<compile_context>
chip_gen: v5e
topology: v5e:2x2
jax: 0.10.0
libtpu: 0.0.40
codegen_flags: <defaults>
</compile_context>

<pallas_src>
import jax
import jax.numpy as jnp
from jax.experimental import pallas as pl
from jax.experimental.pallas import tpu as pltpu

BN_EPS = 1e-5   # PyTorch BatchNorm2d default eps


def non_local_kernel(x_ref, wproj_ref, bproj_ref, weff_ref, beff_ref, o_ref):
    x = x_ref[0].astype(jnp.float32)                              # (C, HW)

    # g / theta / (phi * 1/HW) projections in one small contraction over C.
    # wproj rows: 0 = g_w, 1 = theta_w, 2 = phi_w / HW, rows 3..7 are zero.
    proj = jnp.dot(wproj_ref[...], x,
                   preferred_element_type=jnp.float32) + bproj_ref[...]  # (8, HW)
    g_x = proj[0:1, :]                                            # (1, HW)
    th_x = proj[1:2, :]                                           # (1, HW)
    ph_x = proj[2:3, :]                                           # (1, HW), has 1/HW folded in

    # Rank-1 attention collapse: y = theta_x * (phi_x . g_x)
    s = jnp.sum(ph_x * g_x, axis=1, keepdims=True)                # (1, 1)
    y = th_x * s                                                  # (1, HW)

    # W conv (inter -> C) with eval-mode BN folded in, plus residual.
    w_y = weff_ref[...] * y + beff_ref[...]                       # (C, HW)
    o_ref[0] = (x + w_y).astype(o_ref.dtype)


def non_local_pallas(x_nchw, params):
    B, C, H, W = x_nchw.shape
    HW = H * W
    x_chw = x_nchw.reshape(B, C, HW)          # free reshape, keeps NCHW layout

    inv_hw = jnp.float32(1.0 / HW)

    # Projection weights packed into one (8, C) matrix; 1/HW folded into phi.
    wproj = jnp.zeros((8, C), jnp.float32)
    wproj = wproj.at[0, :].set(params["g_w"].astype(jnp.float32))
    wproj = wproj.at[1, :].set(params["theta_w"].astype(jnp.float32))
    wproj = wproj.at[2, :].set(params["phi_w"].astype(jnp.float32) * inv_hw)

    bproj = jnp.zeros((8, 1), jnp.float32)
    bproj = bproj.at[0, 0].set(params["g_b"][0].astype(jnp.float32))
    bproj = bproj.at[1, 0].set(params["theta_b"][0].astype(jnp.float32))
    bproj = bproj.at[2, 0].set(params["phi_b"][0].astype(jnp.float32) * inv_hw)

    # Fold eval-mode BatchNorm into the W conv: per-output-channel affine.
    inv_std = jax.lax.rsqrt(params["bn_var"].astype(jnp.float32) + BN_EPS)
    bn_scale = params["bn_gamma"].astype(jnp.float32) * inv_std
    bn_shift = (params["bn_beta"].astype(jnp.float32)
                - params["bn_mean"].astype(jnp.float32) * bn_scale)
    weff = (params["W_w"].astype(jnp.float32) * bn_scale).reshape(C, 1)
    beff = (params["W_b"].astype(jnp.float32) * bn_scale + bn_shift).reshape(C, 1)

    const2d = lambda shape: pl.BlockSpec(shape, lambda b: (0, 0))

    out_chw = pl.pallas_call(
        non_local_kernel,
        out_shape=jax.ShapeDtypeStruct((B, C, HW), x_nchw.dtype),
        grid=(B,),
        in_specs=[
            pl.BlockSpec((1, C, HW), lambda b: (b, 0, 0)),
            const2d((8, C)),
            const2d((8, 1)),
            const2d((C, 1)),
            const2d((C, 1)),
        ],
        out_specs=pl.BlockSpec((1, C, HW), lambda b: (b, 0, 0)),
        compiler_params=pltpu.CompilerParams(dimension_semantics=("parallel",)),
    )(x_chw, wproj, bproj, weff, beff)

    return out_chw.reshape(B, C, H, W)


def non_local_reference(x, params):
    """Pure-JAX reference mirroring the PyTorch forward (eval-mode BN)."""
    B, C, H, W = x.shape
    HW = H * W
    xr = x.reshape(B, C, HW).astype(jnp.float32)

    def conv1x1(inp, w, b):  # w: (Co, Ci), b: (Co,)
        return jnp.einsum("oc,bcn->bon", w, inp) + b[None, :, None]

    g_x = jnp.transpose(conv1x1(xr, params["g_w"][None, :], params["g_b"]), (0, 2, 1))
    th = jnp.transpose(conv1x1(xr, params["theta_w"][None, :], params["theta_b"]), (0, 2, 1))
    ph = conv1x1(xr, params["phi_w"][None, :], params["phi_b"])            # (B,1,HW)
    f = jnp.matmul(th, ph)                                                 # (B,HW,HW)
    y = jnp.matmul(f / HW, g_x)                                            # (B,HW,1)
    yr = jnp.transpose(y, (0, 2, 1))                                       # (B,1,HW)
    w_y = conv1x1(yr, params["W_w"][:, None], params["W_b"])               # (B,C,HW)
    inv_std = jax.lax.rsqrt(params["bn_var"] + BN_EPS)
    w_y = ((w_y - params["bn_mean"][None, :, None]) * inv_std[None, :, None]
           * params["bn_gamma"][None, :, None] + params["bn_beta"][None, :, None])
    return (w_y.reshape(B, C, H, W) + x.astype(jnp.float32)).astype(x.dtype)


if __name__ == "__main__":
    key = jax.random.PRNGKey(0)
    B, C, H, W = 2, 4, 16, 16
    keys = jax.random.split(key, 13)
    x = jax.random.normal(keys[0], (B, C, H, W), jnp.float32)

    # NOTE: fastreid initializes the BN of W to zero (branch is a no-op at
    # init); for a meaningful numerical test we use nonzero BN params and
    # non-trivial running stats so the full non-local path is exercised.
    params = {
        # 1x1 conv weights: torch shape (1, C, 1, 1) -> stored as (C,); bias (1,)
        "g_w":     0.1 * jax.random.normal(keys[1], (C,), jnp.float32),
        "g_b":     0.1 * jax.random.normal(keys[2], (1,), jnp.float32),
        "theta_w": 0.1 * jax.random.normal(keys[3], (C,), jnp.float32),
        "theta_b": 0.1 * jax.random.normal(keys[4], (1,), jnp.float32),
        "phi_w":   0.1 * jax.random.normal(keys[5], (C,), jnp.float32),
        "phi_b":   0.1 * jax.random.normal(keys[6], (1,), jnp.float32),
        # W conv: torch shape (C, 1, 1, 1) -> (C,); bias (C,)
        "W_w":     0.1 * jax.random.normal(keys[7], (C,), jnp.float32),
        "W_b":     0.1 * jax.random.normal(keys[8], (C,), jnp.float32),
        # BatchNorm affine + running stats (nonzero/non-trivial for the test)
        "bn_gamma": 1.0 + 0.1 * jax.random.normal(keys[9], (C,), jnp.float32),
        "bn_beta":  0.1 * jax.random.normal(keys[10], (C,), jnp.float32),
        "bn_mean":  0.1 * jax.random.normal(keys[11], (C,), jnp.float32),
        "bn_var":   jax.random.uniform(keys[12], (C,), jnp.float32, 0.5, 1.5),
    }

    out = jax.block_until_ready(non_local_pallas(x, params))
    ref = jax.block_until_ready(non_local_reference(x, params))

    assert out.shape == x.shape and out.dtype == x.dtype
    max_err = float(jnp.max(jnp.abs(out - ref)))
    assert max_err < 1e-4, f"mismatch vs reference: {max_err}"
    print("KERNEL_OK")
</pallas_src>

<mosaic_0001>
module attributes {stable_mosaic.version = 11 : i64} {
  func.func @non_local_kernel(%arg0: i32, %arg1: memref<1x4x256xf32, #tpu.memory_space<vmem>>, %arg2: memref<8x4xf32, #tpu.memory_space<vmem>>, %arg3: memref<8x1xf32, #tpu.memory_space<vmem>>, %arg4: memref<4x1xf32, #tpu.memory_space<vmem>>, %arg5: memref<4x1xf32, #tpu.memory_space<vmem>>, %arg6: memref<1x4x256xf32, #tpu.memory_space<vmem>>) attributes {dimension_semantics = [#tpu.dimension_semantics<parallel>], iteration_bounds = array<i64: 2>, scalar_prefetch = 0 : i64, scratch_operands = 0 : i64, tpu.core_type = #tpu.core_type<tc>, window_params = [{transform_indices = @transform_0, window_bounds = array<i64: 1, 4, 256>}, {pipeline_mode = #tpu.pipeline_mode<synchronous>, transform_indices = @transform_1, window_bounds = array<i64: 8, 4>}, {pipeline_mode = #tpu.pipeline_mode<synchronous>, transform_indices = @transform_2, window_bounds = array<i64: 8, 1>}, {pipeline_mode = #tpu.pipeline_mode<synchronous>, transform_indices = @transform_3, window_bounds = array<i64: 4, 1>}, {pipeline_mode = #tpu.pipeline_mode<synchronous>, transform_indices = @transform_4, window_bounds = array<i64: 4, 1>}, {transform_indices = @transform_5, window_bounds = array<i64: 1, 4, 256>}]} {
    %c0 = arith.constant 0 : index
    %c0_0 = arith.constant 0 : index
    %c0_1 = arith.constant 0 : index
    %0 = vector.load %arg1[%c0, %c0_0, %c0_1] : memref<1x4x256xf32, #tpu.memory_space<vmem>>, vector<1x4x256xf32>
    %1 = vector.shape_cast %0 : vector<1x4x256xf32> to vector<4x256xf32>
    %c0_2 = arith.constant 0 : index
    %c0_3 = arith.constant 0 : index
    %2 = vector.load %arg2[%c0_2, %c0_3] : memref<8x4xf32, #tpu.memory_space<vmem>>, vector<8x4xf32>
    %cst = arith.constant dense<0.000000e+00> : vector<8x256xf32>
    %3 = tpu.matmul %2, %1, %cst {dimension_numbers = #tpu.dot_dimension_numbers<[1], [0], [0], [1], [0, 0, 1, 1], [], []>} : vector<8x4xf32>, vector<4x256xf32>, vector<8x256xf32> -> vector<8x256xf32>
    %c0_4 = arith.constant 0 : index
    %c0_5 = arith.constant 0 : index
    %4 = vector.load %arg3[%c0_4, %c0_5] : memref<8x1xf32, #tpu.memory_space<vmem>>, vector<8x1xf32>
    %5 = vector.broadcast %4 : vector<8x1xf32> to vector<8x256xf32>
    %6 = arith.addf %3, %5 : vector<8x256xf32>
    %7 = vector.extract_strided_slice %6 {offsets = [0, 0], sizes = [1, 256], strides = [1, 1]} : vector<8x256xf32> to vector<1x256xf32>
    %8 = vector.extract_strided_slice %6 {offsets = [1, 0], sizes = [1, 256], strides = [1, 1]} : vector<8x256xf32> to vector<1x256xf32>
    %9 = vector.extract_strided_slice %6 {offsets = [2, 0], sizes = [1, 256], strides = [1, 1]} : vector<8x256xf32> to vector<1x256xf32>
    %10 = arith.mulf %9, %7 : vector<1x256xf32>
    %cst_6 = arith.constant dense<0.000000e+00> : vector<1xf32>
    %11 = vector.multi_reduction <add>, %10, %cst_6 [1] : vector<1x256xf32> to vector<1xf32>
    %12 = vector.shape_cast %11 : vector<1xf32> to vector<1x1xf32>
    %13 = vector.broadcast %12 : vector<1x1xf32> to vector<1x256xf32>
    %14 = arith.mulf %8, %13 : vector<1x256xf32>
    %c0_7 = arith.constant 0 : index
    %c0_8 = arith.constant 0 : index
    %15 = vector.load %arg4[%c0_7, %c0_8] : memref<4x1xf32, #tpu.memory_space<vmem>>, vector<4x1xf32>
    %16 = vector.broadcast %15 : vector<4x1xf32> to vector<4x256xf32>
    %17 = vector.broadcast %14 : vector<1x256xf32> to vector<4x256xf32>
    %18 = arith.mulf %16, %17 : vector<4x256xf32>
    %c0_9 = arith.constant 0 : index
    %c0_10 = arith.constant 0 : index
    %19 = vector.load %arg5[%c0_9, %c0_10] : memref<4x1xf32, #tpu.memory_space<vmem>>, vector<4x1xf32>
    %20 = vector.broadcast %19 : vector<4x1xf32> to vector<4x256xf32>
    %21 = arith.addf %18, %20 : vector<4x256xf32>
    %22 = arith.addf %1, %21 : vector<4x256xf32>
    %c0_11 = arith.constant 0 : index
    %c0_12 = arith.constant 0 : index
    %c0_13 = arith.constant 0 : index
    %23 = vector.load %arg6[%c0_11, %c0_12, %c0_13] : memref<1x4x256xf32, #tpu.memory_space<vmem>>, vector<1x4x256xf32>
    %24 = vector.shape_cast %23 : vector<1x4x256xf32> to vector<4x256xf32>
    %25 = vector.shape_cast %22 : vector<4x256xf32> to vector<1x4x256xf32>
    tpu.vector_store %arg6[%c0_11, %c0_12, %c0_13], %25 {strides = array<i32>} : memref<1x4x256xf32, #tpu.memory_space<vmem>>, vector<1x4x256xf32>,
    return
  }
  func.func @transform_0(%arg0: i32) -> (i32, i32, i32) {
    %c0_i32 = arith.constant 0 : i32
    %c0_i32_0 = arith.constant 0 : i32
    %c0_i32_1 = arith.constant 0 : i32
    return %arg0, %c0_i32, %c0_i32_0 : i32, i32, i32
  }
  func.func @transform_1(%arg0: i32) -> (i32, i32) {
    %c0_i32 = arith.constant 0 : i32
    %c0_i32_0 = arith.constant 0 : i32
    %c0_i32_1 = arith.constant 0 : i32
    return %c0_i32, %c0_i32_0 : i32, i32
  }
  func.func @transform_2(%arg0: i32) -> (i32, i32) {
    %c0_i32 = arith.constant 0 : i32
    %c0_i32_0 = arith.constant 0 : i32
    %c0_i32_1 = arith.constant 0 : i32
    return %c0_i32, %c0_i32_0 : i32, i32
  }
  func.func @transform_3(%arg0: i32) -> (i32, i32) {
    %c0_i32 = arith.constant 0 : i32
    %c0_i32_0 = arith.constant 0 : i32
    %c0_i32_1 = arith.constant 0 : i32
    return %c0_i32, %c0_i32_0 : i32, i32
  }
  func.func @transform_4(%arg0: i32) -> (i32, i32) {
    %c0_i32 = arith.constant 0 : i32
    %c0_i32_0 = arith.constant 0 : i32
    %c0_i32_1 = arith.constant 0 : i32
    return %c0_i32, %c0_i32_0 : i32, i32
  }
  func.func @transform_5(%arg0: i32) -> (i32, i32, i32) {
    %c0_i32 = arith.constant 0 : i32
    %c0_i32_0 = arith.constant 0 : i32
    %c0_i32_1 = arith.constant 0 : i32
    return %arg0, %c0_i32, %c0_i32_0 : i32, i32, i32
  }
}

</mosaic_0001>

<bundles_post_ra>
// kernel: tpu_custom_call.1
= control target key start
LH: loop header
LB: loop body
LE: loop exit
PB: predicated region body
PF: predicated region fallthrough
CT: control target
= control target key end

     0   :  { %10 = vsyncpa [#allocation3], 0  ;;  %s659_s0 = inlined_call_operand.vmem [shape: f32[2,4,256], index: 0, kind: input, shape index: {}]   ;;  %s660_s1 = inlined_call_operand.vmem [shape: f32[8,4], index: 1, kind: input, shape index: {}]   ;;  %s661_s2 = inlined_call_operand.vmem [shape: f32[8,1], index: 2, kind: input, shape index: {}]   ;;  %s662_s3 = inlined_call_operand.vmem [shape: f32[4,1], index: 3, kind: input, shape index: {}]   ;;  %s663_s4 = inlined_call_operand.vmem [shape: f32[4,1], index: 4, kind: input, shape index: {}]   ;;  %s664_s5 = inlined_call_operand.hbm [shape: f32[2,4,256], index: 5, kind: output, shape index: {}]  }
   0x1   :  { %12 = vsyncpa [#allocation3 + $0x1], 0  ;;  %s559_s18 = smov 0   ;;  %s561_s19 = smov 0  }
   0x2   :  { %s563_s20 = smov 0   ;;  %s565_s21 = smov 0  }
   0x3 LB: > { %s580_s22 = sadd.s32 4294967295, %s526_s21   ;;  %s404_s23 = sadd.s32 4294967294, %s526_s21   ;;  %s526_s21 = sphi %s565_s21, %s670_s21   ;;  %s522_s20 = sphi %s563_s20, %s669_s20   ;;  %s518_s19 = sphi %s561_s19, %s668_s19   ;;  %s514_s18 = sphi %s559_s18, %s667_s18  }
   0x4   : > { %s584_s24 = sadd.s32 1, %s526_s21   ;;  %s135_s25 = sadd.s32 1, %s522_s20 }
   0x5   : > { %s132_s26 = ssub.s32 %s526_s21, %s584_s24  ;;  %p145_p0 = scmp.ne.s32.totalorder %s522_s20, %s518_s19 }
   0x6   : > { %p133_p1 = scmp.eq.s32.totalorder %s132_s26, 0  ;;  %p146_p2 = scmp.eq.s32.totalorder %s580_s22, 1 }
   0x7   : > { %p151_p3 = scmp.ne.s32.totalorder %s518_s19, %s514_s18  ;;  %p152_p4 = scmp.eq.s32.totalorder %s404_s23, 1 }
   0x8   : > { %s595_s27 = scalar_select %p133_p1, %s522_s20, %s135_s25  }
   0x9   : > { %p597_p5 = por %p146_p2, %p145_p0  ;;  %p601_p6 = por %p152_p4, %p151_p3 }
   0xa   : > { %p407_p7 = scmp.ge.s32.totalorder %s526_s21, 1  ;;  %p190_p8 = scmp.lt.s32.totalorder %s526_s21, 3 }
   0xc   : > { %p191_p9 = pnand %p407_p7, %p190_p8 }
   0xd   : > { %p218_p10 = scmp.lt.s32.totalorder (!%p191_p9), %s580_s22, 1  ;;  %s215_s23 = sand.u32 (!%p191_p9), 1, %s518_s19  }
   0xe   : > { %194 = sbr.rel (%p191_p9) target bundleno = 302 (0x12e), region = 40  ;;  %s408_s25 = sshll.u32 (!%p191_p9), %s215_s23, 3 }
   0xf   : > { %s421_s26 = sshll.u32 (!%p191_p9), %s580_s22, 3  ;;  %s484_s15 = scalar_lea.hbm (!%p191_p9), %s664_s5, 16 }
  0x13   : > { %v225_v0 = vld [vmem:[%s661_s2] sm:$0xff]  ;;  %v528_v1 = vmov 0   ;;  %s219_s7 = scalar_select %p218_p10, %s580_s22, 1  ;;  %vm239_vm0 = vcmask 1043456   ;;  %vm235_vm1 = vcmask 31744   ;;  %vm292_vm2 = vcmask 1042434  }
  0x14   : > { %462 = vset.pattern.permute.xlu0 %v528_v1  ;;  %463 = vset.pattern.permute.xlu1 %v528_v1  ;;  %v224_v3 = vld [vmem:[%s660_s1] sm:$0xff]  ;;  %s329_s22 = scalar_lea.sflag [#allocation3], %s215_s23 }
  0x15   : > { %228 = vperm.xlu0 %462, %v225_v0   ;;  %s420_s8 = sshll.u32 %s219_s7, 3  ;;  %v303_v6 = vld [vmem:[%s662_s3] sm:$0xf]  ;;  %s340_s7 = scalar_lea.hbm %s664_s5, %s421_s26 }
  0x16   : > { %s222_s11 = scalar_lea.vmem %s659_s0, %s420_s8  ;;  %306 = vperm.xlu1 %463, %v303_v6   ;;  %v313_v7 = vld [vmem:[%s663_s4] sm:$0xf]  ;;  %s217_s8 = scalar_lea.vmem [#allocation2], %s408_s25 }
  0x17   : > { %v223_v2 = vld [vmem:[%s222_s11] sm:$0xff]  ;;  %s342_s9 = sshll.u32 %s217_s8, 4  ;;  %s344_s10 = sshll.u32 %s340_s7, 4  ;;  %s343_s9 = int_to_ptr.vmem [resolvable:$true] %s342_s9  ;;  %s345_s10 = int_to_ptr.hbm [resolvable:$true] %s344_s10 }
  0x18   : > { %232 = vst [vmem:[#allocation1] ss:$2 sm:$0xff] %v223_v2  ;;  %s478_s11 = sshra.s32 %s345_s10, 4  ;;  %s479_s11 = int_to_ptr.hbm [resolvable:$true] %s478_s11 }
  0x19   : > { %s480_s12 = scalar_lea.hbm %s479_s11, 8  ;;  %p485_p0 = scmp.lt.s32.totalorder %s479_s11, %s664_s5 }
  0x1a   : > { %p481_p11 = scmp.ne.s32.totalorder %s479_s11, %s480_s12  ;;  %p486_p1 = scmp.lt.s32.totalorder %s484_s15, %s480_s12 }
  0x1c   : > { %p482_p12 = pnand %p481_p11, %p597_p5  ;;  %p487_p2 = por %p486_p1, %p485_p0 }
  0x1e   : > { %316 = vperm.xlu1 %463, %v313_v7   ;;  %p483_p13 = pneg %p482_p12 }
  0x1f   : > { %v233_v4 = vld.sshfl [vmem:[#allocation1] sm:$0xff pattern:$0x75316420]  ;;  %v234_v5 = vld.sshfl [vmem:[#allocation1 + $0x8] sm:$0xff pattern:$0x75316420] }
  0x20   : > { %411 = vmatpush.msk.msra.mxu0 %vm239_vm0, %v233_v4  ;;  %413 = vmatpush.msk.msra.mxu1 %vm239_vm0, %v234_v5  ;;  %p488_p3 = pnand %p487_p2, %p483_p13 }
  0x21   : > { %412 = vmatmul.msk.f32.vlgmr.msra.gmra.mxu0 %vm235_vm1, %v224_v3  ;;  %414 = vmatmul.msk.f32.vlgmr.msra.gmra.mxu1 %vm235_vm1, %v224_v3 }
  0x87   : > { %v229_v8 = vpop.permute.xlu0 %228 }
  0x88   : > { %v307_v20 = vpop.permute.xlu1 %306 }
  0x90   : > { %v317_v29 = vpop.permute.xlu1 %316 }
  0x9e   : > { %v261_v9 = vpop.f32.mrf.mxu0  ;;  %v281_v10 = vpop.f32.mrf.mxu1 }
  0x9f   : > { %v262_v11 = vadd.f32 %v261_v9, %v229_v8  ;;  %v282_v12 = vadd.f32 %v281_v10, %v229_v8 }
  0xa1   : > { %v286_v13 = vrot.slane %v262_v11, 6  ;;  %v287_v14 = vrot.slane %v282_v12, 6 }
  0xa3   : > { %v290_v15 = vmul.f32 %v286_v13, %v262_v11  ;;  %v291_v16 = vmul.f32 %v287_v14, %v282_v12 }
  0xa5   : > { %v293_v17 = vsel %vm292_vm2, %v290_v15, 0.0  ;;  %v294_v18 = vsel %vm292_vm2, %v291_v16, 0.0 }
  0xa6   : > { %v295_v19 = vadd.f32 %v294_v18, %v293_v17 }
  0xa8   : > { %296 = vadd.xlane.f32.xlu0 %v295_v19 }
 0x11b   : > { %v297_v21 = vpop.xlane.xlu0 %296 }
 0x11c   : > { %v299_v22 = vrot.slane %v297_v21, 1 }
 0x11e   : > { %v301_v23 = vmul.f32 %v299_v22, %v262_v11  ;;  %v302_v24 = vmul.f32 %v299_v22, %v282_v12 }
 0x120   : > { %v309_v25 = vperm.slane %v301_v23, 1  ;;  %v310_v26 = vperm.slane %v302_v24, 1 }
 0x122   : > { %v311_v27 = vmul.f32 %v309_v25, %v307_v20  ;;  %v312_v28 = vmul.f32 %v310_v26, %v307_v20 }
 0x124   : > { %v320_v30 = vadd.f32 %v317_v29, %v312_v28  ;;  %v319_v31 = vadd.f32 %v317_v29, %v311_v27 }
 0x126   : > { %v323_v32 = vrot.slane %v320_v30, 4 }
 0x128   : > { %v324_v33 = vsel %vm239_vm0, %v319_v31, %v323_v32 }
 0x129   : > { %v326_v34 = vadd.f32 %v324_v33, %v223_v2 }
 0x12b   : > { %327 = vst [vmem:[%s217_s8] sm:$0xff] %v326_v34 }
 0x12c   : > { %491 = shalt.err (!%p488_p3)
}
 0x12d   : > { %422 = dma.vmem_to_hbm [thread:$0]  (%p597_p5), %s343_s9, 128, %s345_s10, %s329_s22  }
 0x12e PF: > { %p428_p4 = scmp.ge.s32.totalorder %s526_s21, 2  ;;  %s356_s23 = sand.u32 1, %s514_s18  }
 0x12f   : > { %s357_s25 = scalar_lea.sflag [#allocation3], %s356_s23 }
 0x130   : > { %p425_p7 = pnand %p428_p4, %p601_p6 }
 0x132   : > { %p426_p8 = pneg %p425_p7 }
 0x134   : > { %509 = dma.done.wait (%p426_p8), %s357_s25, 128  }
 0x135   : > { %511 = vsyncadd (%p426_p8), %s357_s25, 4294967168  ;;  %p15_p9 = scmp.ge.s32.totalorder %s584_s24, 4   ;;  %s667_s18 = smov %s518_s19 }
 0x136   : > { %s668_s19 = smov %s522_s20  ;;  %s669_s20 = smov %s595_s27 }
 0x137   : > { %s670_s21 = smov %s584_s24  ;;  %17 = sbr.rel (!%p15_p9) target bundleno = 3 (0x3), region = 75 }
 0x13c   :  { %363 = vsyncpa [#allocation3], 1 }
 0x13d   :  { %365 = vsyncpa [#allocation3 + $0x1], 1 }

</bundles_post_ra>
